<compile_context>
chip_gen: v7x
topology: tpu7x:2x2x1
jax: 0.10.0
libtpu: 0.0.40
codegen_flags: <defaults>
</compile_context>

<pallas_src>
import functools
import math

import jax
import jax.numpy as jnp
from jax import lax
from jax.experimental import pallas as pl
from jax.experimental.pallas import tpu as pltpu


def _pick_tile(dim, candidates):
    """Largest candidate that evenly divides `dim`, else the full dim."""
    for c in candidates:
        if dim % c == 0:
            return c
    # TODO(synk): for large dims not divisible by the candidates this falls back to a
    # full-dim block; replace with pl.cdiv grid + in-kernel masking (or padding) so it
    # cannot exceed v7x's 64 MiB VMEM.
    return dim


def _vmem_limit(footprint_bytes):
    """VMEM limit sized from the tile footprint with headroom (v7x physical = 64 MiB)."""
    return int(min(max(footprint_bytes * 1.25 + (4 << 20), 16 << 20), 64 << 20))


# ---------------------------------------------------------------------------
# Tiled linear (x @ w + b) kernel: bf16 MXU operands, f32 accumulation.
# x is cast to bf16 in-kernel (no separate XLA cast pass).
# ---------------------------------------------------------------------------
def _linear_kernel(x_ref, w_ref, b_ref, o_ref, acc_ref):
    k = pl.program_id(2)

    @pl.when(k == 0)
    def _init():
        acc_ref[...] = jnp.zeros(acc_ref.shape, acc_ref.dtype)

    acc_ref[...] += jnp.dot(x_ref[...].astype(jnp.bfloat16), w_ref[...],
                            preferred_element_type=jnp.float32)

    @pl.when(k == pl.num_programs(2) - 1)
    def _finalize():
        o_ref[...] = (acc_ref[...] + b_ref[...]).astype(o_ref.dtype)


def _linear(x, w, b, *, out_dtype):
    """out = x @ w + b.  x:(M,K) f32/bf16, w:(K,N) bf16, b:(1,N) f32 -> (M,N)."""
    M, K = x.shape
    Kw, N = w.shape
    assert K == Kw and b.shape == (1, N)

    tm = _pick_tile(M, (512, 256, 128))
    tn = _pick_tile(N, (512, 384, 256, 128))   # 384 covers 3*C axes
    tk = _pick_tile(K, (512, 256, 128))
    grid = (M // tm, N // tn, K // tk)

    out_isz = jnp.dtype(out_dtype).itemsize
    flops = 2 * M * N * K
    bytes_accessed = (M * K * x.dtype.itemsize + K * N * w.dtype.itemsize
                      + M * N * out_isz + N * 4)
    # double-buffered inputs/outputs + f32 accumulator
    footprint = (2 * (tm * tk * x.dtype.itemsize + tk * tn * w.dtype.itemsize
                      + tm * tn * out_isz + tn * 4)
                 + tm * tn * 4)

    return pl.pallas_call(
        _linear_kernel,
        out_shape=jax.ShapeDtypeStruct((M, N), out_dtype),
        grid=grid,
        in_specs=[
            pl.BlockSpec((tm, tk), lambda i, j, k: (i, k)),   # x tile
            pl.BlockSpec((tk, tn), lambda i, j, k: (k, j)),   # w tile
            pl.BlockSpec((1, tn), lambda i, j, k: (0, j)),    # bias tile
        ],
        out_specs=pl.BlockSpec((tm, tn), lambda i, j, k: (i, j)),
        scratch_shapes=[pltpu.VMEM((tm, tn), jnp.float32)],
        compiler_params=pltpu.CompilerParams(
            dimension_semantics=("parallel", "parallel", "arbitrary"),
            vmem_limit_bytes=_vmem_limit(footprint),
        ),
        cost_estimate=pl.CostEstimate(flops=int(flops), transcendentals=0,
                                      bytes_accessed=int(bytes_accessed)),
    )(x, w, b)


# ---------------------------------------------------------------------------
# Flash attention with K/V fully resident per (batch*head).
# Grid: (B*H, q-blocks). KV sweep is an in-kernel fori_loop with online softmax.
# ---------------------------------------------------------------------------
def _flash_kernel(q_ref, k_ref, v_ref, o_ref, m_ref, l_ref, acc_ref,
                  *, tq, tkc, seq_len, is_causal):
    qi = pl.program_id(1)

    # Per (b*h, q-block) state lives in VMEM scratch; (re)initialized every grid step.
    m_ref[...] = jnp.full(m_ref.shape, -jnp.inf, m_ref.dtype)
    l_ref[...] = jnp.zeros(l_ref.shape, l_ref.dtype)
    acc_ref[...] = jnp.zeros(acc_ref.shape, acc_ref.dtype)

    q = q_ref[...]                                   # (tq, hd) bf16, scale pre-folded

    if is_causal:
        # Hoisted out of the kv loop (JAX does not CSE broadcast_iota inside loops).
        row_idx = qi * tq + lax.broadcasted_iota(jnp.int32, (tq, tkc), 0)
        col_iota = lax.broadcasted_iota(jnp.int32, (tq, tkc), 1)

    def step(c, masked):
        start = pl.multiple_of(c * tkc, tkc)
        kb = k_ref[pl.ds(start, tkc), :]             # (tkc, hd) bf16
        vb = v_ref[pl.ds(start, tkc), :]             # (tkc, hd) bf16
        # s = q @ k^T without materializing a transpose.
        s = lax.dot_general(q, kb, (((1,), (1,)), ((), ())),
                            preferred_element_type=jnp.float32)   # (tq, tkc) f32
        if masked:
            s = jnp.where(start + col_iota <= row_idx, s, jnp.float32(-1e30))

        m_prev = m_ref[...]                                          # (tq, 1)
        m_new = jnp.maximum(m_prev, jnp.max(s, axis=-1, keepdims=True))
        alpha = jnp.exp(m_prev - m_new)
        p = jnp.exp(s - m_new)                                       # f32 (v5e-safe)
        l_ref[...] = alpha * l_ref[...] + jnp.sum(p, axis=-1, keepdims=True)
        acc_ref[...] = alpha * acc_ref[...] + jnp.dot(
            p.astype(vb.dtype), vb, preferred_element_type=jnp.float32)
        m_ref[...] = m_new

    def _unmasked_body(c, carry):
        step(c, False)
        return carry

    def _masked_body(c, carry):
        step(c, True)
        return carry

    if is_causal:
        first_row = qi * tq
        last_row = first_row + tq - 1
        n_full = first_row // tkc          # chunks fully below the diagonal: no mask
        n_diag_end = last_row // tkc + 1   # chunks straddling the diagonal: masked
        lax.fori_loop(0, n_full, _unmasked_body, 0)
        lax.fori_loop(n_full, n_diag_end, _masked_body, 0)
        # chunks >= n_diag_end are fully above the diagonal -> never visited
    else:
        lax.fori_loop(0, seq_len // tkc, _unmasked_body, 0)

    o_ref[...] = (acc_ref[...] * pl.reciprocal(l_ref[...], approx=True)
                  ).astype(o_ref.dtype)


def _flash_attention(qkv, *, is_causal):
    """qkv: (3, B*H, T, hd) bf16 (q pre-scaled). Returns (B*H, T, hd) bf16.

    K/V are held fully resident in VMEM per (b, h).  For T=1024, hd<=128 this is
    <1 MiB; for very long sequences add a streaming fallback.
    """
    # TODO(synk): add a kv-streaming fallback (grid over kv blocks) for very long T
    # where 2*T*hd double-buffered K/V would not fit v7x's 64 MiB VMEM.
    _, BH, T, hd = qkv.shape
    tq = _pick_tile(T, (512, 256, 128))
    tkc = _pick_tile(T, (256, 512, 128))   # 256-wide s chunks: friendlier to v5e vst
    nq = T // tq

    itemsize = qkv.dtype.itemsize
    causal_div = 2 if is_causal else 1
    flops = 4 * BH * T * T * hd // causal_div            # q@k^T and p@v
    transcendentals = BH * T * T // causal_div            # exp
    # q, k, v each read once; output written once.
    bytes_accessed = 4 * BH * T * hd * itemsize

    footprint = (2 * 2 * tq * hd * itemsize               # q/out double buffers
                 + 2 * 2 * T * hd * itemsize              # K+V double buffers
                 + tq * (hd + 2) * 4                      # m/l/acc scratch
                 + 4 * tq * tkc * 4)                      # s/p temporaries (headroom)

    kernel = functools.partial(_flash_kernel, tq=tq, tkc=tkc, seq_len=T,
                               is_causal=is_causal)

    return pl.pallas_call(
        kernel,
        out_shape=jax.ShapeDtypeStruct((BH, T, hd), qkv.dtype),
        grid=(BH, nq),
        in_specs=[
            # Three views of the same (3, BH, T, hd) buffer -> no XLA slice copies.
            pl.BlockSpec((None, None, tq, hd), lambda b, i: (0, b, i, 0)),  # q block
            pl.BlockSpec((None, None, T, hd), lambda b, i: (1, b, 0, 0)),   # K resident
            pl.BlockSpec((None, None, T, hd), lambda b, i: (2, b, 0, 0)),   # V resident
        ],
        out_specs=pl.BlockSpec((None, tq, hd), lambda b, i: (b, i, 0)),
        scratch_shapes=[
            pltpu.VMEM((tq, 1), jnp.float32),     # running max m
            pltpu.VMEM((tq, 1), jnp.float32),     # running denom l
            pltpu.VMEM((tq, hd), jnp.float32),    # f32 output accumulator
        ],
        compiler_params=pltpu.CompilerParams(
            dimension_semantics=("parallel", "parallel"),
            vmem_limit_bytes=_vmem_limit(footprint),
        ),
        cost_estimate=pl.CostEstimate(flops=int(flops),
                                      transcendentals=int(transcendentals),
                                      bytes_accessed=int(bytes_accessed)),
    )(qkv, qkv, qkv)


# ---------------------------------------------------------------------------
# Parameter prep (hoisted out of the forward path) + full forward pass.
# ---------------------------------------------------------------------------
def prepare_params(w_qkv, b_qkv, w_proj, b_proj, *, n_head):
    """One-time weight prep: fold 1/sqrt(hd) into the q columns, cast to bf16."""
    C = w_qkv.shape[0]
    assert C % n_head == 0
    hd = C // n_head
    scale = 1.0 / math.sqrt(hd)
    col_scale = jnp.concatenate([jnp.full((C,), scale, jnp.float32),
                                 jnp.ones((2 * C,), jnp.float32)])
    return {
        "w_qkv": (w_qkv * col_scale[None, :]).astype(jnp.bfloat16),
        "b_qkv": (b_qkv * col_scale[None, :]).astype(jnp.float32),
        "w_proj": w_proj.astype(jnp.bfloat16),
        "b_proj": b_proj.astype(jnp.float32),
    }


@functools.partial(jax.jit, static_argnames=("n_head", "is_causal"))
def causal_self_attention(x, params, *, n_head, is_causal=False):
    """Pallas-backed forward of CausalSelfAttention.

    x: (B, T, C) f32.  params: output of prepare_params().
    """
    # TODO(synk): arbitrary `attention_mask` (attn_mask of F.scaled_dot_product_attention)
    # is not supported; only the is_causal flag is handled.
    B, T, C = x.shape
    H = n_head
    hd = C // H

    # 1) QKV projection (f32 x cast to bf16 in-kernel, f32 accumulation).
    qkv = _linear(x.reshape(B * T, C), params["w_qkv"], params["b_qkv"],
                  out_dtype=jnp.bfloat16)                          # (B*T, 3C)

    # TODO(synk): these two bf16 layout transposes are still XLA-level HBM round
    # trips; eliminating them via BlockSpecs needs 1-sized blocks on the
    # second-to-last dim (the head axis), which the TPU (8,128) block tiling rules
    # disallow for hd < 128.
    qkv = qkv.reshape(B, T, 3, H, hd).transpose(2, 0, 3, 1, 4).reshape(3, B * H, T, hd)

    # 2) Flash attention, K/V resident per (b, h).
    y = _flash_attention(qkv, is_causal=is_causal)                 # (B*H, T, hd) bf16

    # 3) Output projection.
    y = y.reshape(B, H, T, hd).transpose(0, 2, 1, 3).reshape(B * T, C)
    out = _linear(y, params["w_proj"], params["b_proj"], out_dtype=x.dtype)
    return out.reshape(B, T, C)


# ---------------------------------------------------------------------------
# Pure-JAX reference mirroring the PyTorch forward (f32).
# ---------------------------------------------------------------------------
def _reference(x, w_qkv, b_qkv, w_proj, b_proj, *, n_head, is_causal):
    B, T, C = x.shape
    hd = C // n_head
    qkv = x @ w_qkv + b_qkv[0]
    q, k, v = jnp.split(qkv, 3, axis=-1)
    q = q.reshape(B, T, n_head, hd).transpose(0, 2, 1, 3)
    k = k.reshape(B, T, n_head, hd).transpose(0, 2, 1, 3)
    v = v.reshape(B, T, n_head, hd).transpose(0, 2, 1, 3)
    s = jnp.einsum("bhqd,bhkd->bhqk", q, k) / math.sqrt(hd)
    if is_causal:
        row = lax.broadcasted_iota(jnp.int32, (T, T), 0)
        col = lax.broadcasted_iota(jnp.int32, (T, T), 1)
        s = jnp.where(col <= row, s, -jnp.inf)
    p = jax.nn.softmax(s, axis=-1)
    y = jnp.einsum("bhqk,bhkd->bhqd", p, v)
    y = y.transpose(0, 2, 1, 3).reshape(B, T, C)
    return y @ w_proj + b_proj[0]


def _run_case(key, B, T, C, n_head):
    kx, k1, k2, k3, k4 = jax.random.split(key, 5)
    x = jax.random.normal(kx, (B, T, C), dtype=jnp.float32)
    bound = 1.0 / math.sqrt(C)
    w_qkv = jax.random.uniform(k1, (C, 3 * C), jnp.float32, -bound, bound)
    b_qkv = jax.random.uniform(k2, (1, 3 * C), jnp.float32, -bound, bound)
    w_proj = jax.random.uniform(k3, (C, C), jnp.float32, -bound, bound)
    b_proj = jax.random.uniform(k4, (1, C), jnp.float32, -bound, bound)

    params = prepare_params(w_qkv, b_qkv, w_proj, b_proj, n_head=n_head)

    ok = True
    for is_causal in (False, True):    # PyTorch forward defaults to is_causal=False
        out = causal_self_attention(x, params, n_head=n_head, is_causal=is_causal)
        out = jax.block_until_ready(out)
        ref = _reference(x, w_qkv, b_qkv, w_proj, b_proj,
                         n_head=n_head, is_causal=is_causal)
        # bf16 MXU operands with f32 accumulation -> compare at ~1e-2 tolerance.
        ok = ok and bool(jnp.allclose(out, ref, atol=2e-2, rtol=2e-2))
    return ok


if __name__ == "__main__":
    key = jax.random.PRNGKey(0)
    k_small, k_big = jax.random.split(key, 2)

    ok = True
    # Small config consistent with GPTConfig (n_embd=32, n_head=4).
    ok = ok and _run_case(k_small, B=2, T=8, C=32, n_head=4)
    # Larger config exercising multi-block tiling, resident K/V and the causal split.
    ok = ok and _run_case(k_big, B=2, T=1024, C=128, n_head=4)

    print("KERNEL_OK" if ok else "KERNEL_MISMATCH")
</pallas_src>

<mosaic_0001>
module attributes {stable_mosaic.version = 11 : i64} {
  func.func @_linear_kernel(%arg0: i32, %arg1: i32, %arg2: i32, %arg3: memref<16x32xf32, #tpu.memory_space<vmem>>, %arg4: memref<32x96xbf16, #tpu.memory_space<vmem>>, %arg5: memref<1x96xf32, #tpu.memory_space<vmem>>, %arg6: memref<16x96xbf16, #tpu.memory_space<vmem>>, %arg7: memref<16x96xf32, #tpu.memory_space<vmem>>) attributes {dimension_semantics = [#tpu.dimension_semantics<parallel>, #tpu.dimension_semantics<parallel>, #tpu.dimension_semantics<arbitrary>], iteration_bounds = array<i64: 1, 1, 1>, scalar_prefetch = 0 : i64, scratch_operands = 1 : i64, tpu.core_type = #tpu.core_type<tc>, window_params = [{transform_indices = @transform_0, window_bounds = array<i64: 16, 32>}, {transform_indices = @transform_1, window_bounds = array<i64: 32, 96>}, {transform_indices = @transform_2, window_bounds = array<i64: 1, 96>}, {transform_indices = @transform_3, window_bounds = array<i64: 16, 96>}]} {
    %c0_i32 = arith.constant 0 : i32
    %0 = arith.cmpi eq, %arg2, %c0_i32 : i32
    %1 = arith.extui %0 : i1 to i32
    %c0_i32_0 = arith.constant 0 : i32
    %2 = arith.cmpi ne, %1, %c0_i32_0 : i32
    scf.if %2 {
      %cst_10 = arith.constant 0.000000e+00 : f32
      %13 = vector.broadcast %cst_10 : f32 to vector<16x96xf32>
      %c0_11 = arith.constant 0 : index
      %c0_12 = arith.constant 0 : index
      %14 = vector.load %arg7[%c0_11, %c0_12] : memref<16x96xf32, #tpu.memory_space<vmem>>, vector<16x96xf32>
      tpu.vector_store %arg7[%c0_11, %c0_12], %13 {strides = array<i32>} : memref<16x96xf32, #tpu.memory_space<vmem>>, vector<16x96xf32>,
    } else {
    }
    %c0 = arith.constant 0 : index
    %c0_1 = arith.constant 0 : index
    %3 = vector.load %arg7[%c0, %c0_1] : memref<16x96xf32, #tpu.memory_space<vmem>>, vector<16x96xf32>
    %c0_2 = arith.constant 0 : index
    %c0_3 = arith.constant 0 : index
    %4 = vector.load %arg3[%c0_2, %c0_3] : memref<16x32xf32, #tpu.memory_space<vmem>>, vector<16x32xf32>
    %5 = arith.truncf %4 : vector<16x32xf32> to vector<16x32xbf16>
    %c0_4 = arith.constant 0 : index
    %c0_5 = arith.constant 0 : index
    %6 = vector.load %arg4[%c0_4, %c0_5] : memref<32x96xbf16, #tpu.memory_space<vmem>>, vector<32x96xbf16>
    %cst = arith.constant dense<0.000000e+00> : vector<16x96xf32>
    %7 = tpu.matmul %5, %6, %cst {dimension_numbers = #tpu.dot_dimension_numbers<[1], [0], [0], [1], [0, 0, 1, 1], [], []>} : vector<16x32xbf16>, vector<32x96xbf16>, vector<16x96xf32> -> vector<16x96xf32>
    %8 = arith.addf %3, %7 : vector<16x96xf32>
    %c0_6 = arith.constant 0 : index
    %c0_7 = arith.constant 0 : index
    %9 = vector.load %arg7[%c0_6, %c0_7] : memref<16x96xf32, #tpu.memory_space<vmem>>, vector<16x96xf32>
    tpu.vector_store %arg7[%c0_6, %c0_7], %8 {strides = array<i32>} : memref<16x96xf32, #tpu.memory_space<vmem>>, vector<16x96xf32>,
    %c0_i32_8 = arith.constant 0 : i32
    %10 = arith.cmpi eq, %arg2, %c0_i32_8 : i32
    %11 = arith.extui %10 : i1 to i32
    %c0_i32_9 = arith.constant 0 : i32
    %12 = arith.cmpi ne, %11, %c0_i32_9 : i32
    scf.if %12 {
      %c0_10 = arith.constant 0 : index
      %c0_11 = arith.constant 0 : index
      %13 = vector.load %arg7[%c0_10, %c0_11] : memref<16x96xf32, #tpu.memory_space<vmem>>, vector<16x96xf32>
      %c0_12 = arith.constant 0 : index
      %c0_13 = arith.constant 0 : index
      %14 = vector.load %arg5[%c0_12, %c0_13] : memref<1x96xf32, #tpu.memory_space<vmem>>, vector<1x96xf32>
      %15 = vector.broadcast %14 : vector<1x96xf32> to vector<16x96xf32>
      %16 = arith.addf %13, %15 : vector<16x96xf32>
      %17 = arith.truncf %16 : vector<16x96xf32> to vector<16x96xbf16>
      %c0_14 = arith.constant 0 : index
      %c0_15 = arith.constant 0 : index
      %18 = vector.load %arg6[%c0_14, %c0_15] : memref<16x96xbf16, #tpu.memory_space<vmem>>, vector<16x96xbf16>
      tpu.vector_store %arg6[%c0_14, %c0_15], %17 {strides = array<i32>} : memref<16x96xbf16, #tpu.memory_space<vmem>>, vector<16x96xbf16>,
    } else {
    }
    return
  }
  func.func @transform_0(%arg0: i32, %arg1: i32, %arg2: i32) -> (i32, i32) {
    %c0_i32 = arith.constant 0 : i32
    return %arg0, %arg2 : i32, i32
  }
  func.func @transform_1(%arg0: i32, %arg1: i32, %arg2: i32) -> (i32, i32) {
    %c0_i32 = arith.constant 0 : i32
    return %arg2, %arg1 : i32, i32
  }
  func.func @transform_2(%arg0: i32, %arg1: i32, %arg2: i32) -> (i32, i32) {
    %c0_i32 = arith.constant 0 : i32
    %c0_i32_0 = arith.constant 0 : i32
    return %c0_i32, %arg1 : i32, i32
  }
  func.func @transform_3(%arg0: i32, %arg1: i32, %arg2: i32) -> (i32, i32) {
    %c0_i32 = arith.constant 0 : i32
    return %arg0, %arg1 : i32, i32
  }
}

module attributes {stable_mosaic.version = 11 : i64} {
  func.func @_flash_kernel(%arg0: i32, %arg1: i32, %arg2: memref<1x1x8x8xbf16, #tpu.memory_space<vmem>>, %arg3: memref<1x1x8x8xbf16, #tpu.memory_space<vmem>>, %arg4: memref<1x1x8x8xbf16, #tpu.memory_space<vmem>>, %arg5: memref<1x8x8xbf16, #tpu.memory_space<vmem>>, %arg6: memref<8x1xf32, #tpu.memory_space<vmem>>, %arg7: memref<8x1xf32, #tpu.memory_space<vmem>>, %arg8: memref<8x8xf32, #tpu.memory_space<vmem>>) attributes {dimension_semantics = [#tpu.dimension_semantics<parallel>, #tpu.dimension_semantics<parallel>], iteration_bounds = array<i64: 8, 1>, scalar_prefetch = 0 : i64, scratch_operands = 3 : i64, tpu.core_type = #tpu.core_type<tc>, window_params = [{transform_indices = @transform_0, window_bounds = array<i64: 1, 1, 8, 8>}, {transform_indices = @transform_1, window_bounds = array<i64: 1, 1, 8, 8>}, {transform_indices = @transform_2, window_bounds = array<i64: 1, 1, 8, 8>}, {transform_indices = @transform_3, window_bounds = array<i64: 1, 8, 8>}]} {
    %cst = arith.constant 0xFF800000 : f32
    %0 = vector.broadcast %cst : f32 to vector<8x1xf32>
    %c0 = arith.constant 0 : index
    %c0_0 = arith.constant 0 : index
    %1 = vector.load %arg6[%c0, %c0_0] : memref<8x1xf32, #tpu.memory_space<vmem>>, vector<8x1xf32>
    tpu.vector_store %arg6[%c0, %c0_0], %0 {strides = array<i32>} : memref<8x1xf32, #tpu.memory_space<vmem>>, vector<8x1xf32>,
    %cst_1 = arith.constant 0.000000e+00 : f32
    %2 = vector.broadcast %cst_1 : f32 to vector<8x1xf32>
    %c0_2 = arith.constant 0 : index
    %c0_3 = arith.constant 0 : index
    %3 = vector.load %arg7[%c0_2, %c0_3] : memref<8x1xf32, #tpu.memory_space<vmem>>, vector<8x1xf32>
    tpu.vector_store %arg7[%c0_2, %c0_3], %2 {strides = array<i32>} : memref<8x1xf32, #tpu.memory_space<vmem>>, vector<8x1xf32>,
    %cst_4 = arith.constant 0.000000e+00 : f32
    %4 = vector.broadcast %cst_4 : f32 to vector<8x8xf32>
    %c0_5 = arith.constant 0 : index
    %c0_6 = arith.constant 0 : index
    %5 = vector.load %arg8[%c0_5, %c0_6] : memref<8x8xf32, #tpu.memory_space<vmem>>, vector<8x8xf32>
    tpu.vector_store %arg8[%c0_5, %c0_6], %4 {strides = array<i32>} : memref<8x8xf32, #tpu.memory_space<vmem>>, vector<8x8xf32>,
    %c0_7 = arith.constant 0 : index
    %c0_8 = arith.constant 0 : index
    %c0_9 = arith.constant 0 : index
    %c0_10 = arith.constant 0 : index
    %6 = vector.load %arg2[%c0_7, %c0_8, %c0_9, %c0_10] : memref<1x1x8x8xbf16, #tpu.memory_space<vmem>>, vector<1x1x8x8xbf16>
    %7 = vector.shape_cast %6 : vector<1x1x8x8xbf16> to vector<8x8xbf16>
    %c0_i32 = arith.constant 0 : i32
    %c8_i32 = arith.constant 8 : i32
    %8 = arith.muli %c0_i32, %c8_i32 : i32
    %9 = tpu.assume_multiple %8, 8 : i32
    %c0_11 = arith.constant 0 : index
    %c0_12 = arith.constant 0 : index
    %10 = arith.index_cast %9 : i32 to index
    %c0_13 = arith.constant 0 : index
    %11 = vector.load %arg3[%c0_11, %c0_12, %10, %c0_13] : memref<1x1x8x8xbf16, #tpu.memory_space<vmem>>, vector<1x1x8x8xbf16>
    %12 = vector.shape_cast %11 : vector<1x1x8x8xbf16> to vector<8x8xbf16>
    %c0_14 = arith.constant 0 : index
    %c0_15 = arith.constant 0 : index
    %13 = arith.index_cast %9 : i32 to index
    %c0_16 = arith.constant 0 : index
    %14 = vector.load %arg4[%c0_14, %c0_15, %13, %c0_16] : memref<1x1x8x8xbf16, #tpu.memory_space<vmem>>, vector<1x1x8x8xbf16>
    %15 = vector.shape_cast %14 : vector<1x1x8x8xbf16> to vector<8x8xbf16>
    %cst_17 = arith.constant dense<0.000000e+00> : vector<8x8xf32>
    %16 = tpu.matmul %7, %12, %cst_17 {dimension_numbers = #tpu.dot_dimension_numbers<[1], [1], [0], [0], [0, 0, 1, 0], [], []>} : vector<8x8xbf16>, vector<8x8xbf16>, vector<8x8xf32> -> vector<8x8xf32>
    %c0_18 = arith.constant 0 : index
    %c0_19 = arith.constant 0 : index
    %17 = vector.load %arg6[%c0_18, %c0_19] : memref<8x1xf32, #tpu.memory_space<vmem>>, vector<8x1xf32>
    %cst_20 = arith.constant dense<0xFF800000> : vector<8xf32>
    %18 = vector.multi_reduction <maximumf>, %16, %cst_20 [1] : vector<8x8xf32> to vector<8xf32>
    %19 = vector.shape_cast %18 : vector<8xf32> to vector<8x1xf32>
    %20 = arith.maximumf %17, %19 : vector<8x1xf32>
    %21 = arith.subf %17, %20 : vector<8x1xf32>
    %22 = math.exp %21 : vector<8x1xf32>
    %23 = vector.broadcast %20 : vector<8x1xf32> to vector<8x8xf32>
    %24 = arith.subf %16, %23 : vector<8x8xf32>
    %25 = math.exp %24 : vector<8x8xf32>
    %c0_21 = arith.constant 0 : index
    %c0_22 = arith.constant 0 : index
    %26 = vector.load %arg7[%c0_21, %c0_22] : memref<8x1xf32, #tpu.memory_space<vmem>>, vector<8x1xf32>
    %27 = arith.mulf %22, %26 : vector<8x1xf32>
    %cst_23 = arith.constant dense<0.000000e+00> : vector<8xf32>
    %28 = vector.multi_reduction <add>, %25, %cst_23 [1] : vector<8x8xf32> to vector<8xf32>
    %29 = vector.shape_cast %28 : vector<8xf32> to vector<8x1xf32>
    %30 = arith.addf %27, %29 : vector<8x1xf32>
    %c0_24 = arith.constant 0 : index
    %c0_25 = arith.constant 0 : index
    %31 = vector.load %arg7[%c0_24, %c0_25] : memref<8x1xf32, #tpu.memory_space<vmem>>, vector<8x1xf32>
    tpu.vector_store %arg7[%c0_24, %c0_25], %30 {strides = array<i32>} : memref<8x1xf32, #tpu.memory_space<vmem>>, vector<8x1xf32>,
    %c0_26 = arith.constant 0 : index
    %c0_27 = arith.constant 0 : index
    %32 = vector.load %arg8[%c0_26, %c0_27] : memref<8x8xf32, #tpu.memory_space<vmem>>, vector<8x8xf32>
    %33 = vector.broadcast %22 : vector<8x1xf32> to vector<8x8xf32>
    %34 = arith.mulf %33, %32 : vector<8x8xf32>
    %35 = arith.truncf %25 : vector<8x8xf32> to vector<8x8xbf16>
    %cst_28 = arith.constant dense<0.000000e+00> : vector<8x8xf32>
    %36 = tpu.matmul %35, %15, %cst_28 {dimension_numbers = #tpu.dot_dimension_numbers<[1], [0], [0], [1], [0, 0, 1, 1], [], []>} : vector<8x8xbf16>, vector<8x8xbf16>, vector<8x8xf32> -> vector<8x8xf32>
    %37 = arith.addf %34, %36 : vector<8x8xf32>
    %c0_29 = arith.constant 0 : index
    %c0_30 = arith.constant 0 : index
    %38 = vector.load %arg8[%c0_29, %c0_30] : memref<8x8xf32, #tpu.memory_space<vmem>>, vector<8x8xf32>
    tpu.vector_store %arg8[%c0_29, %c0_30], %37 {strides = array<i32>} : memref<8x8xf32, #tpu.memory_space<vmem>>, vector<8x8xf32>,
    %c0_31 = arith.constant 0 : index
    %c0_32 = arith.constant 0 : index
    %39 = vector.load %arg6[%c0_31, %c0_32] : memref<8x1xf32, #tpu.memory_space<vmem>>, vector<8x1xf32>
    tpu.vector_store %arg6[%c0_31, %c0_32], %20 {strides = array<i32>} : memref<8x1xf32, #tpu.memory_space<vmem>>, vector<8x1xf32>,
    %c1_i32 = arith.constant 1 : i32
    %c0_33 = arith.constant 0 : index
    %c0_34 = arith.constant 0 : index
    %40 = vector.load %arg8[%c0_33, %c0_34] : memref<8x8xf32, #tpu.memory_space<vmem>>, vector<8x8xf32>
    %c0_35 = arith.constant 0 : index
    %c0_36 = arith.constant 0 : index
    %41 = vector.load %arg7[%c0_35, %c0_36] : memref<8x1xf32, #tpu.memory_space<vmem>>, vector<8x1xf32>
    %42 = tpu.reciprocal %41 {approx = true} : vector<8x1xf32> -> vector<8x1xf32>
    %43 = vector.broadcast %42 : vector<8x1xf32> to vector<8x8xf32>
    %44 = arith.mulf %40, %43 : vector<8x8xf32>
    %45 = arith.truncf %44 : vector<8x8xf32> to vector<8x8xbf16>
    %c0_37 = arith.constant 0 : index
    %c0_38 = arith.constant 0 : index
    %c0_39 = arith.constant 0 : index
    %46 = vector.load %arg5[%c0_37, %c0_38, %c0_39] : memref<1x8x8xbf16, #tpu.memory_space<vmem>>, vector<1x8x8xbf16>
    %47 = vector.shape_cast %46 : vector<1x8x8xbf16> to vector<8x8xbf16>
    %48 = vector.shape_cast %45 : vector<8x8xbf16> to vector<1x8x8xbf16>
    tpu.vector_store %arg5[%c0_37, %c0_38, %c0_39], %48 {strides = array<i32>} : memref<1x8x8xbf16, #tpu.memory_space<vmem>>, vector<1x8x8xbf16>,
    return
  }
  func.func @transform_0(%arg0: i32, %arg1: i32) -> (i32, i32, i32, i32) {
    %c0_i32 = arith.constant 0 : i32
    %c0_i32_0 = arith.constant 0 : i32
    %c0_i32_1 = arith.constant 0 : i32
    return %c0_i32, %arg0, %arg1, %c0_i32_0 : i32, i32, i32, i32
  }
  func.func @transform_1(%arg0: i32, %arg1: i32) -> (i32, i32, i32, i32) {
    %c1_i32 = arith.constant 1 : i32
    %c0_i32 = arith.constant 0 : i32
    %c0_i32_0 = arith.constant 0 : i32
    %c0_i32_1 = arith.constant 0 : i32
    return %c1_i32, %arg0, %c0_i32, %c0_i32_0 : i32, i32, i32, i32
  }
  func.func @transform_2(%arg0: i32, %arg1: i32) -> (i32, i32, i32, i32) {
    %c2_i32 = arith.constant 2 : i32
    %c0_i32 = arith.constant 0 : i32
    %c0_i32_0 = arith.constant 0 : i32
    %c0_i32_1 = arith.constant 0 : i32
    return %c2_i32, %arg0, %c0_i32, %c0_i32_0 : i32, i32, i32, i32
  }
  func.func @transform_3(%arg0: i32, %arg1: i32) -> (i32, i32, i32) {
    %c0_i32 = arith.constant 0 : i32
    %c0_i32_0 = arith.constant 0 : i32
    return %arg0, %arg1, %c0_i32 : i32, i32, i32
  }
}

module attributes {stable_mosaic.version = 11 : i64} {
  func.func @_linear_kernel(%arg0: i32, %arg1: i32, %arg2: i32, %arg3: memref<16x32xbf16, #tpu.memory_space<vmem>>, %arg4: memref<32x32xbf16, #tpu.memory_space<vmem>>, %arg5: memref<1x32xf32, #tpu.memory_space<vmem>>, %arg6: memref<16x32xf32, #tpu.memory_space<vmem>>, %arg7: memref<16x32xf32, #tpu.memory_space<vmem>>) attributes {dimension_semantics = [#tpu.dimension_semantics<parallel>, #tpu.dimension_semantics<parallel>, #tpu.dimension_semantics<arbitrary>], iteration_bounds = array<i64: 1, 1, 1>, scalar_prefetch = 0 : i64, scratch_operands = 1 : i64, tpu.core_type = #tpu.core_type<tc>, window_params = [{transform_indices = @transform_0, window_bounds = array<i64: 16, 32>}, {transform_indices = @transform_1, window_bounds = array<i64: 32, 32>}, {transform_indices = @transform_2, window_bounds = array<i64: 1, 32>}, {transform_indices = @transform_3, window_bounds = array<i64: 16, 32>}]} {
    %c0_i32 = arith.constant 0 : i32
    %0 = arith.cmpi eq, %arg2, %c0_i32 : i32
    %1 = arith.extui %0 : i1 to i32
    %c0_i32_0 = arith.constant 0 : i32
    %2 = arith.cmpi ne, %1, %c0_i32_0 : i32
    scf.if %2 {
      %cst_10 = arith.constant 0.000000e+00 : f32
      %12 = vector.broadcast %cst_10 : f32 to vector<16x32xf32>
      %c0_11 = arith.constant 0 : index
      %c0_12 = arith.constant 0 : index
      %13 = vector.load %arg7[%c0_11, %c0_12] : memref<16x32xf32, #tpu.memory_space<vmem>>, vector<16x32xf32>
      tpu.vector_store %arg7[%c0_11, %c0_12], %12 {strides = array<i32>} : memref<16x32xf32, #tpu.memory_space<vmem>>, vector<16x32xf32>,
    } else {
    }
    %c0 = arith.constant 0 : index
    %c0_1 = arith.constant 0 : index
    %3 = vector.load %arg7[%c0, %c0_1] : memref<16x32xf32, #tpu.memory_space<vmem>>, vector<16x32xf32>
    %c0_2 = arith.constant 0 : index
    %c0_3 = arith.constant 0 : index
    %4 = vector.load %arg3[%c0_2, %c0_3] : memref<16x32xbf16, #tpu.memory_space<vmem>>, vector<16x32xbf16>
    %c0_4 = arith.constant 0 : index
    %c0_5 = arith.constant 0 : index
    %5 = vector.load %arg4[%c0_4, %c0_5] : memref<32x32xbf16, #tpu.memory_space<vmem>>, vector<32x32xbf16>
    %cst = arith.constant dense<0.000000e+00> : vector<16x32xf32>
    %6 = tpu.matmul %4, %5, %cst {dimension_numbers = #tpu.dot_dimension_numbers<[1], [0], [0], [1], [0, 0, 1, 1], [], []>} : vector<16x32xbf16>, vector<32x32xbf16>, vector<16x32xf32> -> vector<16x32xf32>
    %7 = arith.addf %3, %6 : vector<16x32xf32>
    %c0_6 = arith.constant 0 : index
    %c0_7 = arith.constant 0 : index
    %8 = vector.load %arg7[%c0_6, %c0_7] : memref<16x32xf32, #tpu.memory_space<vmem>>, vector<16x32xf32>
    tpu.vector_store %arg7[%c0_6, %c0_7], %7 {strides = array<i32>} : memref<16x32xf32, #tpu.memory_space<vmem>>, vector<16x32xf32>,
    %c0_i32_8 = arith.constant 0 : i32
    %9 = arith.cmpi eq, %arg2, %c0_i32_8 : i32
    %10 = arith.extui %9 : i1 to i32
    %c0_i32_9 = arith.constant 0 : i32
    %11 = arith.cmpi ne, %10, %c0_i32_9 : i32
    scf.if %11 {
      %c0_10 = arith.constant 0 : index
      %c0_11 = arith.constant 0 : index
      %12 = vector.load %arg7[%c0_10, %c0_11] : memref<16x32xf32, #tpu.memory_space<vmem>>, vector<16x32xf32>
      %c0_12 = arith.constant 0 : index
      %c0_13 = arith.constant 0 : index
      %13 = vector.load %arg5[%c0_12, %c0_13] : memref<1x32xf32, #tpu.memory_space<vmem>>, vector<1x32xf32>
      %14 = vector.broadcast %13 : vector<1x32xf32> to vector<16x32xf32>
      %15 = arith.addf %12, %14 : vector<16x32xf32>
      %c0_14 = arith.constant 0 : index
      %c0_15 = arith.constant 0 : index
      %16 = vector.load %arg6[%c0_14, %c0_15] : memref<16x32xf32, #tpu.memory_space<vmem>>, vector<16x32xf32>
      tpu.vector_store %arg6[%c0_14, %c0_15], %15 {strides = array<i32>} : memref<16x32xf32, #tpu.memory_space<vmem>>, vector<16x32xf32>,
    } else {
    }
    return
  }
  func.func @transform_0(%arg0: i32, %arg1: i32, %arg2: i32) -> (i32, i32) {
    %c0_i32 = arith.constant 0 : i32
    return %arg0, %arg2 : i32, i32
  }
  func.func @transform_1(%arg0: i32, %arg1: i32, %arg2: i32) -> (i32, i32) {
    %c0_i32 = arith.constant 0 : i32
    return %arg2, %arg1 : i32, i32
  }
  func.func @transform_2(%arg0: i32, %arg1: i32, %arg2: i32) -> (i32, i32) {
    %c0_i32 = arith.constant 0 : i32
    %c0_i32_0 = arith.constant 0 : i32
    return %c0_i32, %arg1 : i32, i32
  }
  func.func @transform_3(%arg0: i32, %arg1: i32, %arg2: i32) -> (i32, i32) {
    %c0_i32 = arith.constant 0 : i32
    return %arg0, %arg1 : i32, i32
  }
}

</mosaic_0001>

<bundles_post_ra>
// kernel: causal_self_attention.3
= control target key start
LH: loop header
LB: loop body
LE: loop exit
PB: predicated region body
PF: predicated region fallthrough
CT: control target
= control target key end

     0   :  { %8 = vsyncpa [#allocation4], 0  ;;  %s187_s12 = smov [#allocation3]   ;;  %s243_s0 = inlined_call_operand.hbm [shape: f32[16,32], index: 0, kind: input, shape index: {}]   ;;  %s244_s1 = inlined_call_operand.vmem [shape: bf16[32,96], index: 1, kind: input, shape index: {}]   ;;  %s245_s2 = inlined_call_operand.vmem [shape: f32[1,96], index: 2, kind: input, shape index: {}]   ;;  %s246_s3 = inlined_call_operand.vmem [shape: bf16[16,96], index: 3, kind: output, shape index: {}]  }
   0x1   :  { %s14_s13 = sshll.u32 %s187_s12, 4  ;;  %s163_s16 = scalar_lea.hbm %s243_s0, 256  ;;  %s15_s13 = int_to_ptr.vmem [resolvable:$true] %s14_s13 }
   0x2   :  { %p164_p0 = scmp.ne.s32.totalorder %s243_s0, %s163_s16  ;;  %p167_p1 = scmp.lt.u32.totalorder %s163_s16, %s243_s0 }
   0x4   :  { %p169_p2 = pnand %p167_p1, %p164_p0 }
   0x6   :  { %172 = shalt.err (!%p169_p2)
}
   0x7   :  { %s173_s21 = scalar_lea.vmem %s15_s13, 256  ;;  %p178_p4 = scmp.lt.s32.totalorder %s15_s13, %s15_s13 }
   0x8   :  { %p174_p3 = scmp.ne.s32.totalorder %s15_s13, %s173_s21  ;;  %p179_p5 = scmp.lt.s32.totalorder %s173_s21, %s173_s21 }
   0xa   :  { %p180_p6 = por %p179_p5, %p178_p4 }
   0xc   :  { %p181_p7 = pnand %p180_p6, %p174_p3 }
   0xe   :  { %184 = shalt.err (!%p181_p7)
}
   0xf   :  { %s188_s22 = smov 128   ;;  %s189_s23 = smov 8  }
  0x10   :  { %20 = dma.hbm_to_vmem [thread:$0]  %s243_s0, 256, %s15_s13, [#allocation4], %s188_s22, %s188_s22, %s189_s23  }
  0x11   :  { %185 = dma.done.wait [#allocation4], 256  }
  0x12   :  { %186 = vsyncadd [#allocation4], 4294967040  ;;  %vm33_vm0 = vcmask 785408   ;;  %v190_v0 = vmov 0.0   ;;  %vm191_vm1 = vmmov 0   ;;  %v161_v1 = vld [vmem:[%s244_s1] sm:$0xff]  }
  0x13   :  { %34 = vst.msk [vmem:[#allocation2] sm:$0xff] %vm33_vm0, %v190_v0  ;;  %35 = vst.msk [vmem:[#allocation2 + $0x8] sm:$0xff] %vm33_vm0, %v190_v0  ;;  %148 = vmatprep.subr.bf16.mxu0 %v190_v0  ;;  %152 = vmatprep.mubr.msk.bf16.mxu0 %vm191_vm1, %v190_v0  ;;  %v162_v2 = vld [vmem:[%s244_s1 + $0x8] sm:$0xff]   ;;  %v38_v3 = vld [vmem:[#allocation3] sm:$0xff]  ;;  %vm57_vm2 = vcmask 261120   ;;  %vm129_vm3 = vcmask 781312  }
  0x14   :  { %149 = vmatpush3.bf16.msra.mxu0 %v161_v1  ;;  %v39_v4 = vld [vmem:[#allocation3 + $0x8] sm:$0xff]  ;;  %v140_v14 = vld [vmem:[%s245_s2] ss:$0 sm:$0xff] }
  0x15   :  { %150 = vmatprep.subr.bf16.mxu0 %v190_v0  ;;  %v40_v5 = vpack.c.bf16 %v39_v4, %v38_v3 }
  0x18   :  { %151 = vmatpush3.bf16.msra.mxu0 %v162_v2 }
  0x1a   :  { %v36_v6 = vld [vmem:[#allocation2] sm:$0xff]  ;;  %v37_v8 = vld [vmem:[#allocation2 + $0x8] sm:$0xff] }
  0x1b   :  { %153 = vmatmul.mubr.msk.bf16.vlgmr.msra.gmra.mrb[0].mxu0 %vm57_vm2, %v40_v5 }
  0xee   :  { %v95_v7 = vpop.f32.mrb[0].mxu0 }
  0xef   :  { %v102_v9 = vadd.f32 %v95_v7, %v36_v6  ;;  %v154_v10 = vpop.f32.mrb[1].mxu0 }
  0xf0   :  { %v98_v11 = vpop.f32.mrb[2].mxu0 }
  0xf1   :  { %105 = vst.msk [vmem:[#allocation2] sm:$0xff] %vm33_vm0, %v102_v9  ;;  %v103_v12 = vadd.f32 %v98_v11, %v37_v8  ;;  %v155_v13 = vpop.f32.mrb[3].mxu0 }
  0xf3   :  { %106 = vst.msk [vmem:[#allocation2 + $0x8] sm:$0xff] %vm33_vm0, %v103_v12 }
  0xf8   :  { %v110_v15 = vld [vmem:[#allocation2] sm:$0xff] }
  0xf9   :  { %v119_v16 = vadd.f32 %v140_v14, %v110_v15 }
  0xfa   :  { %v111_v17 = vld [vmem:[#allocation2 + $0x8] sm:$0xff] }
  0xfb   :  { %v143_v18 = vpack.c.bf16 %v119_v16, %v119_v16  ;;  %v120_v19 = vadd.f32 %v140_v14, %v111_v17 }
  0xfd   :  { %130 = vst.msk [vmem:[%s246_s3] sm:$0xf] %vm129_vm3, %v143_v18  ;;  %v144_v20 = vpack.c.bf16 %v120_v19, %v120_v19 }
  0xff   :  { %131 = vst.msk [vmem:[%s246_s3 + $0x4] sm:$0xf] %vm129_vm3, %v144_v20 }
 0x100   :  { %136 = vsyncpa [#allocation4], 1 }

// kernel: causal_self_attention.4
= control target key start
LH: loop header
LB: loop body
LE: loop exit
PB: predicated region body
PF: predicated region fallthrough
CT: control target
= control target key end

     0   :  { %s604_s12 = smov 0   ;;  %s606_s13 = smov 0   ;;  %s660_s0 = inlined_call_operand.vmem [shape: bf16[3,8,8,8], index: 0, kind: input, shape index: {}, may-alias: {0,1,2}]   ;;  %s661_s1 = inlined_call_operand.vmem [shape: bf16[3,8,8,8], index: 1, kind: input, shape index: {}, may-alias: {0,1,2}]   ;;  %s662_s2 = inlined_call_operand.vmem [shape: bf16[3,8,8,8], index: 2, kind: input, shape index: {}, may-alias: {0,1,2}]   ;;  %s663_s3 = inlined_call_operand.vmem [shape: bf16[8,8,8], index: 3, kind: output, shape index: {}]  }
   0x1   :  { %s608_s14 = smov 0  }
   0x2 LB: > { %s25_s15 = sadd.s32 1, %s574_s13  ;;  %p493_p0 = scmp.ge.s32.totalorder %s578_s14, 1  ;;  %s578_s14 = sphi %s608_s14, %s13_s14   ;;  %s574_s13 = sphi %s606_s13, %s665_s13   ;;  %s570_s12 = sphi %s604_s12, %s664_s12  }
   0x3   : > { %p27_p1 = scmp.ge.s32.totalorder %s25_s15, 8  ;;  %p175_p2 = scmp.lt.s32.totalorder %s578_s14, 9 }
   0x5   : > { %s667_s15 = smov (%p27_p1, %s25_s15), 0  ;;  %p176_p3 = pnand %p493_p0, %p175_p2 }
   0x6   : > { %p213_p4 = scmp.lt.s32.totalorder (!%p176_p3), %s570_s12, 7  ;;  %vm241_vm0 = vcmask (!%p176_p3), 64512   ;;  %v580_v0 = vmov (!%p176_p3), 0.0   ;;  %vm581_vm1 = vmmov (!%p176_p3), 0   ;;  %vm238_vm2 = vcmask (!%p176_p3), 7168  }
   0x7   : > { %179 = sbr.rel (%p176_p3) target bundleno = 823 (0x337), region = 32  ;;  %508 = vmatprep.subr.bf16.mxu0 (!%p176_p3), %v580_v0  ;;  %242 = vst.msk [vmem:[#allocation4] sm:$0xff] (!%p176_p3), %vm241_vm0, %v580_v0  ;;  %510 = vmatprep.mubr.msk.bf16.mxu0 (!%p176_p3), %vm581_vm1, %v580_v0  ;;  %v582_v4 = vmov (!%p176_p3), -inf   ;;  %v583_v10 = vmov (!%p176_p3), 0   ;;  %vm326_vm3 = vcmask (!%p176_p3), 1043456   ;;  %vm383_vm4 = vcmask (!%p176_p3), 60416  }
   0x8   : > { %514 = vmatprep.subr.bf16.mxu1 (!%p176_p3), %v580_v0  ;;  %516 = vmatprep.mubr.msk.bf16.mxu1 (!%p176_p3), %vm581_vm1, %v580_v0  ;;  %239 = vst.msk [vmem:[#allocation2] sm:$0xff] (!%p176_p3), %vm238_vm2, %v582_v4  ;;  %240 = vst.msk [vmem:[#allocation3] sm:$0xff] (!%p176_p3), %vm238_vm2, %v580_v0 }
   0x9   : > { %548 = vset.pattern.permute.xlu0 (!%p176_p3), %v583_v10  ;;  %549 = vset.pattern.permute.xlu1 (!%p176_p3), %v583_v10 }
   0xe   : > { %s669_s12 = smov (!%p213_p4, %s570_s12), 7  ;;  %v315_v31 = vld [vmem:[#allocation4] sm:$0xff] }
   0xf   : > { %s623_s16 = sshll.u32 %s669_s12, 2  ;;  %v292_v11 = vld [vmem:[#allocation2] sm:$0xff]  ;;  %v308_v25 = vld [vmem:[#allocation3] sm:$0xff] }
  0x10   : > { %s435_s19 = scalar_lea.vmem %s661_s1, %s623_s16  ;;  %s219_s22 = scalar_lea.vmem %s660_s0, %s623_s16 }
  0x11   : > { %v498_v1 = vld [vmem:[%s435_s19 + $0x20] sm:$0xf]  ;;  %s438_s25 = scalar_lea.vmem %s662_s2, %s623_s16  ;;  %s236_s28 = scalar_lea.vmem %s663_s3, %s623_s16 }
  0x12   : > { %v250_v2 = vsel %vm241_vm0, %v498_v1, 0  ;;  %v243_v3 = vld [vmem:[%s219_s22] sm:$0xf] }
  0x13   : > { %509 = vmatpush3.bf16.xpose.msra.mxu0 %v250_v2  ;;  %v499_v15 = vld [vmem:[%s438_s25 + $0x40] sm:$0xf] }
  0x14   : > { %v328_v16 = vsel %vm326_vm3, %v499_v15, 0 }
  0x15   : > { %515 = vmatpush3.bf16.msra.mxu1 %v328_v16 }
  0x1a   : > { %511 = vmatmul.mubr.msk.bf16.vlgmr.msra.gmra.mrb[0].mxu0 %vm241_vm0, %v243_v3 }
  0xed   : > { %v286_v5 = vpop.f32.mrb[0].mxu0 }
  0xee   : > { %v512_v6 = vpop.f32.mrb[1].mxu0  ;;  %v293_v7 = vsel %vm241_vm0, %v286_v5, -inf }
  0xef   : > { %294 = vmax.xlane.f32.xlu0 %v293_v7  ;;  %v289_v8 = vpop.f32.mrb[2].mxu0 }
  0xf0   : > { %v513_v9 = vpop.f32.mrb[3].mxu0 }
 0x17c   : > { %v295_v12 = vpop.xlane.xlu0 %294 }
 0x17d   : > { %v296_v13 = vmax.f32 %v292_v11, %v295_v12 }
 0x17f   : > { %v297_v14 = vsub.f32 %v292_v11, %v296_v13  ;;  %372 = vst.msk [vmem:[#allocation2] sm:$0xff] %vm238_vm2, %v296_v13  ;;  %302 = vperm.xlu0 %548, %v296_v13  }
 0x181   : > { %v298_v23 = vmul.f32 1.442695, %v297_v14 }
 0x1fe   : > { %v303_v17 = vpop.permute.xlu0 %302 }
 0x1ff   : > { %v305_v18 = vsub.f32 %v286_v5, %v303_v17 }
 0x201   : > { %v306_v19 = vmul.f32 1.442695, %v305_v18 }
 0x203   : > { %550 = vpow2.f32 %v306_v19 }
 0x204   : > { %552 = vpow2.f32 %v298_v23 }
 0x20d   : > { %v551_v20 = vpop.eup %550 }
 0x20e   : > { %v310_v21 = vsel %vm241_vm0, %v551_v20, 0.0  ;;  %v322_v22 = vpack.c.bf16 %v551_v20, %v551_v20  ;;  %v553_v24 = vpop.eup %552 }
 0x20f   : > { %311 = vadd.xlane.f32.xlu1 %v310_v21  ;;  %v309_v26 = vmul.f32 %v553_v24, %v308_v25 }
 0x210   : > { %517 = vmatmul.mubr.msk.bf16.vlgmr.msra.gmra.mrb[0].mxu1 %vm241_vm0, %v322_v22 }
 0x220   : > { %318 = vperm.xlu1 %549, %v553_v24  }
 0x29c   : > { %v312_v27 = vpop.xlane.xlu1 %311 }
 0x29d   : > { %v313_v28 = vadd.f32 %v312_v27, %v309_v26 }
 0x29f   : > { %314 = vst.msk [vmem:[#allocation3] sm:$0xff] %vm238_vm2, %v313_v28 }
 0x2a0   : > { %v319_v32 = vpop.permute.xlu1 %318 }
 0x2a1   : > { %v321_v33 = vmul.f32 %v319_v32, %v315_v31 }
 0x2a6   : > { %v374_v29 = vld [vmem:[#allocation3] sm:$0xff] }
 0x2a7   : > { %554 = vrcp.f32 %v374_v29 }
 0x2b1   : > { %v555_v30 = vpop.eup %554 }
 0x2b2   : > { %378 = vperm.xlu1 %549, %v555_v30  }
 0x2e3   : > { %v364_v34 = vpop.f32.mrb[0].mxu1 }
 0x2e4   : > { %v370_v35 = vadd.f32 %v364_v34, %v321_v33  ;;  %v518_v36 = vpop.f32.mrb[1].mxu1 }
 0x2e5   : > { %v367_v37 = vpop.f32.mrb[2].mxu1 }
 0x2e6   : > { %371 = vst.msk [vmem:[#allocation4] sm:$0xff] %vm241_vm0, %v370_v35  ;;  %v519_v38 = vpop.f32.mrb[3].mxu1 }
 0x2ed   : > { %v373_v39 = vld [vmem:[#allocation4] sm:$0xff] }
 0x331   : > { %v379_v40 = vpop.permute.xlu1 %378 }
 0x332   : > { %v381_v41 = vmul.f32 %v379_v40, %v373_v39 }
 0x334   : > { %v382_v42 = vpack.c.bf16 %v381_v41, %v381_v41 }
 0x336   : > { %384 = vst.msk [vmem:[%s236_s28] sm:$0xf] %vm383_vm4, %v382_v42 }
 0x337 PF: > { %s13_s14 = sadd.s32 1, %s578_s14   ;;  %s664_s12 = smov %s574_s13 }
 0x338   : > { %p10_p5 = scmp.ge.s32.totalorder %s13_s14, 10   ;;  %s665_s13 = smov %s667_s15 }
 0x33a   :  { %12 = sbr.rel (!%p10_p5) target bundleno = 2 (0x2), region = 68 }

// kernel: causal_self_attention.5
= control target key start
LH: loop header
LB: loop body
LE: loop exit
PB: predicated region body
PF: predicated region fallthrough
CT: control target
= control target key end

     0   :  { %v177_v1 = vmov 0.0   ;;  %vm178_vm0 = vmmov 0   ;;  %vm20_vm1 = vcmask 261120   ;;  %s233_s0 = inlined_call_operand.vmem [shape: bf16[16,32], index: 0, kind: input, shape index: {}]   ;;  %s234_s1 = inlined_call_operand.vmem [shape: bf16[32,32], index: 1, kind: input, shape index: {}]   ;;  %s235_s2 = inlined_call_operand.vmem [shape: f32[1,32], index: 2, kind: input, shape index: {}]   ;;  %s236_s3 = inlined_call_operand.hbm [shape: f32[16,32], index: 3, kind: output, shape index: {}]  }
   0x1   :  { %v150_v0 = vld [vmem:[%s234_s1] sm:$0xff]   ;;  %137 = vmatprep.subr.bf16.mxu0 %v177_v1  ;;  %v151_v2 = vld [vmem:[%s234_s1 + $0x8] sm:$0xff]   ;;  %141 = vmatprep.mubr.msk.bf16.mxu0 %vm178_vm0, %v177_v1  ;;  %21 = vst.msk [vmem:[#allocation2] sm:$0xff] %vm20_vm1, %v177_v1  ;;  %22 = vst.msk [vmem:[#allocation2 + $0x8] sm:$0xff] %vm20_vm1, %v177_v1 }
   0x2   :  { %138 = vmatpush3.bf16.msra.mxu0 %v150_v0 }
   0x3   :  { %139 = vmatprep.subr.bf16.mxu0 %v177_v1 }
   0x4   :  { %8 = vsyncpa [#allocation4], 0  ;;  %v152_v3 = vld [vmem:[%s233_s0] sm:$0xff]   ;;  %s179_s0 = smov [#allocation3]  }
   0x5   :  { %v133_v12 = vld [vmem:[%s235_s2] ss:$0 sm:$0xff]  ;;  %s118_s19 = sshll.u32 %s179_s0, 4  ;;  %s119_s19 = int_to_ptr.vmem [resolvable:$true] %s118_s19 }
   0x6   :  { %140 = vmatpush3.bf16.msra.mxu0 %v151_v2  ;;  %s153_s20 = scalar_lea.vmem %s119_s19, 256  ;;  %p158_p1 = scmp.lt.s32.totalorder %s119_s19, %s119_s19 }
   0x7   :  { %p154_p0 = scmp.ne.s32.totalorder %s119_s19, %s153_s20  ;;  %p159_p2 = scmp.lt.s32.totalorder %s153_s20, %s153_s20 }
   0x8   :  { %v23_v4 = vld [vmem:[#allocation2] sm:$0xff]  ;;  %v24_v6 = vld [vmem:[#allocation2 + $0x8] sm:$0xff] }
   0x9   :  { %142 = vmatmul.mubr.msk.bf16.vlgmr.msra.gmra.mrb[0].mxu0 %vm20_vm1, %v152_v3  ;;  %p160_p3 = por %p159_p2, %p158_p1 }
   0xb   :  { %p161_p4 = pnand %p160_p3, %p154_p0 }
  0xdc   :  { %v86_v5 = vpop.f32.mrb[0].mxu0 }
  0xdd   :  { %v93_v7 = vadd.f32 %v86_v5, %v23_v4  ;;  %v143_v8 = vpop.f32.mrb[1].mxu0 }
  0xde   :  { %v89_v9 = vpop.f32.mrb[2].mxu0 }
  0xdf   :  { %95 = vst.msk [vmem:[#allocation2] sm:$0xff] %vm20_vm1, %v93_v7  ;;  %v94_v10 = vadd.f32 %v89_v9, %v24_v6  ;;  %v144_v11 = vpop.f32.mrb[3].mxu0 }
  0xe1   :  { %96 = vst.msk [vmem:[#allocation2 + $0x8] sm:$0xff] %vm20_vm1, %v94_v10 }
  0xe6   :  { %v100_v13 = vld [vmem:[#allocation2] sm:$0xff] }
  0xe7   :  { %v109_v14 = vadd.f32 %v133_v12, %v100_v13 }
  0xe8   :  { %v101_v15 = vld [vmem:[#allocation2 + $0x8] sm:$0xff] }
  0xe9   :  { %v110_v16 = vadd.f32 %v133_v12, %v101_v15  ;;  %111 = vst.msk [vmem:[#allocation3] sm:$0xff] %vm20_vm1, %v109_v14 }
  0xeb   :  { %112 = vst.msk [vmem:[#allocation3 + $0x8] sm:$0xff] %vm20_vm1, %v110_v16 }
  0xec   :  { %164 = shalt.err (!%p161_p4)
}
  0xed   :  { %s165_s22 = scalar_lea.hbm %s236_s3, 256 }
  0xee   :  { %p166_p5 = scmp.ne.s32.totalorder %s236_s3, %s165_s22  ;;  %p169_p6 = scmp.lt.u32.totalorder %s165_s22, %s236_s3 }
  0xf0   :  { %p171_p7 = pnand %p169_p6, %p166_p5 }
  0xf2   :  { %174 = shalt.err (!%p171_p7)
}
  0xf3   :  { %s180_s27 = smov 128   ;;  %s181_s28 = smov 8  }
  0xf4   :  { %124 = dma.vmem_to_hbm [thread:$0]  %s119_s19, 256, %s236_s3, [#allocation4], %s180_s27, %s180_s27, %s181_s28  }
  0xf5   :  { %175 = dma.done.wait [#allocation4], 256  }
  0xf6   :  { %176 = vsyncadd [#allocation4], 4294967040 }
  0xf7   :  { %128 = vsyncpa [#allocation4], 1 }

</bundles_post_ra>
